<compile_context>
chip_gen: v7x
topology: tpu7x:2x2x1
jax: 0.10.0
libtpu: 0.0.40
codegen_flags: <defaults>
</compile_context>

<pallas_src>
import functools

import jax
import jax.numpy as jnp
from jax.experimental import pallas as pl
from jax.experimental.pallas import tpu as pltpu


def _mse_partial_kernel(pred_ref, target_ref, out_ref, *,
                        rows_rem, lane_mask_needed, total_cols, tile_cols):
    """One (row, lane) tile: write per-lane partial sums of (pred - target)**2."""
    px = pred_ref[...]
    tx = target_ref[...]
    # Only upcast when inputs are not already f32 (e.g. bf16 path).
    if px.dtype != jnp.float32:
        px = px.astype(jnp.float32)
    if tx.dtype != jnp.float32:
        tx = tx.astype(jnp.float32)

    diff = px - tx
    sq = diff * diff

    # Lane-tail mask: generated only when the lane (D) axis is tiled AND the
    # tile does not divide D (huge-D corner).  Static check -> zero cost in
    # the common (single lane-block) case.
    if lane_mask_needed:
        col = (pl.program_id(1) * tile_cols
               + jax.lax.broadcasted_iota(jnp.int32, sq.shape, 1))
        sq = jnp.where(col < total_cols, sq, jnp.float32(0.0))

    if rows_rem == 0:
        # Reduce only the sublane (row) axis; keep lane-wise partials so the
        # single cross-lane reduce happens once, outside the streaming loop.
        out_ref[...] = jnp.sum(sq, axis=0, keepdims=True)
    else:
        # Ragged row tail: pay the iota/compare/select only on the last
        # row block (perf-review polish).
        is_last_row_block = pl.program_id(0) == pl.num_programs(0) - 1

        @pl.when(jnp.logical_not(is_last_row_block))
        def _():
            out_ref[...] = jnp.sum(sq, axis=0, keepdims=True)

        @pl.when(is_last_row_block)
        def _():
            row = jax.lax.broadcasted_iota(jnp.int32, sq.shape, 0)
            masked = jnp.where(row < rows_rem, sq, jnp.float32(0.0))
            out_ref[...] = jnp.sum(masked, axis=0, keepdims=True)


def _round_down(x, m):
    return max(m, (x // m) * m)


def _round_up(x, m):
    return ((x + m - 1) // m) * m


@functools.partial(jax.jit,
                   static_argnames=("batch_size", "tile_rows", "tile_cols"))
def loss_mse(pred, target, *, batch_size, tile_rows=None, tile_cols=None):
    """pred: (B, D, 1) ; target: (B, D). Returns scalar float32 loss."""
    B, D = target.shape
    assert pred.shape == (B, D, 1), (
        f"pred must be (B, D, 1); got {pred.shape} vs target {target.shape}")

    # Unit-dim squeeze inside the jitted graph -> XLA lowers it to a bitcast
    # (no extra HBM traffic), keeping the kernel tiles lane-dense (B, D).
    pred2d = jax.lax.squeeze(pred, dimensions=(2,))

    p_bytes = jnp.dtype(pred.dtype).itemsize
    t_bytes = jnp.dtype(target.dtype).itemsize
    step_elem_bytes = p_bytes + t_bytes  # HBM bytes read per element per step

    # Sub-32-bit dtypes pack along sublanes; keep auto row tiles aligned to
    # the native packing (f32 -> 8, bf16 -> 16, int8/fp8 -> 32).
    row_align = 8 * max(1, 4 // min(p_bytes, t_bytes))

    # ~16 MiB of real HBM bytes per grid step across both inputs
    # (== 8 MiB per input for f32/f32), dtype-aware.
    step_budget_bytes = 16 << 20
    elems_budget = max(1, step_budget_bytes // step_elem_bytes)

    # Lane (D) tiling only when even `row_align` rows of full-D blow the
    # budget (keeps every generation inside its per-TC VMEM).
    if tile_cols is None:
        if row_align * D > elems_budget:
            tile_cols = _round_down(elems_budget // row_align, 128)
        else:
            tile_cols = D
    else:
        tile_cols = D if tile_cols >= D else _round_down(int(tile_cols), 128)

    if tile_rows is None:
        if tile_cols < D:
            tile_rows = min(row_align, B)
        else:
            tile_rows = _round_down(elems_budget // D, row_align)
            if tile_rows >= B:
                total_in_bytes = B * D * step_elem_bytes
                if total_in_bytes > (2 << 20) and B >= 4 * row_align:
                    # Keep >=2 (aim ~4) parallel row blocks so v7x's second
                    # TensorCore gets work and DMA overlaps the reduce.
                    tile_rows = _round_up(pl.cdiv(B, 4), row_align)
                else:
                    tile_rows = B
    else:
        tile_rows = B if tile_rows >= B else _round_down(int(tile_rows), 8)

    num_row_blocks = pl.cdiv(B, tile_rows)
    num_col_blocks = pl.cdiv(D, tile_cols)

    rows_rem = B % tile_rows                       # static
    lane_mask_needed = (tile_cols < D) and (D % tile_cols != 0)

    # 2 inputs x 2 pipeline buffers + double-buffered (1, tile_cols) output
    # + headroom, clamped to 48 MiB so v7x (64 MiB/TC) keeps compiler scratch.
    in_step_bytes = tile_rows * tile_cols * step_elem_bytes
    vmem_limit = min(48 << 20,
                     max(16 << 20, 2 * in_step_bytes + 2 * tile_cols * 4 + (4 << 20)))

    cost = pl.CostEstimate(
        flops=int(3 * B * D),
        transcendentals=0,
        bytes_accessed=int(B * D * step_elem_bytes + num_row_blocks * D * 4),
    )

    partials = pl.pallas_call(
        functools.partial(_mse_partial_kernel,
                          rows_rem=rows_rem,
                          lane_mask_needed=lane_mask_needed,
                          total_cols=D,
                          tile_cols=tile_cols),
        out_shape=jax.ShapeDtypeStruct((num_row_blocks, D), jnp.float32),
        grid=(num_row_blocks, num_col_blocks),
        in_specs=[
            pl.BlockSpec((tile_rows, tile_cols), lambda i, j: (i, j)),
            pl.BlockSpec((tile_rows, tile_cols), lambda i, j: (i, j)),
        ],
        out_specs=pl.BlockSpec((1, tile_cols), lambda i, j: (i, j)),
        compiler_params=pltpu.CompilerParams(
            dimension_semantics=("parallel", "parallel"),
            vmem_limit_bytes=int(vmem_limit),
        ),
        cost_estimate=cost,
    )(pred2d, target)

    scale = 1.0 / (float(D) * float(batch_size))
    # Tiny final cross-lane/cross-block reduce + static scale (fused by jit).
    return jnp.sum(partials) * scale


if __name__ == "__main__":
    key = jax.random.PRNGKey(0)

    def reference(pred, target, batch_size):
        p = pred[..., 0].astype(jnp.float32)
        t = target.astype(jnp.float32)
        return jnp.sum(jnp.mean((p - t) ** 2, axis=-1)) / batch_size

    # Case 1: small shapes matching the module's usage (single tile, f32).
    B, D = 8, 128
    kp, kt, key = jax.random.split(key, 3)
    pred = jax.random.normal(kp, (B, D, 1), dtype=jnp.float32)
    target = jax.random.normal(kt, (B, D), dtype=jnp.float32)
    out = jax.block_until_ready(loss_mse(pred, target, batch_size=B))
    ref = reference(pred, target, B)
    assert jnp.allclose(out, ref, rtol=1e-5, atol=1e-6), (out, ref)

    # Case 2: multiple row blocks + ragged row tail (pipelined path + gated mask).
    B2, D2 = 40, 256
    kp2, kt2, key = jax.random.split(key, 3)
    pred2 = jax.random.normal(kp2, (B2, D2, 1), dtype=jnp.float32)
    target2 = jax.random.normal(kt2, (B2, D2), dtype=jnp.float32)
    out2 = jax.block_until_ready(
        loss_mse(pred2, target2, batch_size=B2, tile_rows=16))
    ref2 = reference(pred2, target2, B2)
    assert jnp.allclose(out2, ref2, rtol=1e-4, atol=1e-6), (out2, ref2)

    # Case 3: bf16 inputs + 2-D grid with ragged rows AND ragged lanes
    # (exercises dtype-aware sizing, lane tiling and both masks).
    B3, D3 = 24, 384
    kp3, kt3, key = jax.random.split(key, 3)
    pred3 = jax.random.normal(kp3, (B3, D3, 1), dtype=jnp.bfloat16)
    target3 = jax.random.normal(kt3, (B3, D3), dtype=jnp.bfloat16)
    out3 = jax.block_until_ready(
        loss_mse(pred3, target3, batch_size=B3, tile_rows=16, tile_cols=256))
    ref3 = reference(pred3, target3, B3)
    assert jnp.allclose(out3, ref3, rtol=1e-4, atol=1e-4), (out3, ref3)

    print("KERNEL_OK")
</pallas_src>

<mosaic_0001>
module attributes {stable_mosaic.version = 11 : i64} {
  func.func @_mse_partial_kernel(%arg0: i32, %arg1: i32, %arg2: memref<8x128xf32, #tpu.memory_space<vmem>>, %arg3: memref<8x128xf32, #tpu.memory_space<vmem>>, %arg4: memref<1x128xf32, #tpu.memory_space<vmem>>) attributes {dimension_semantics = [#tpu.dimension_semantics<parallel>, #tpu.dimension_semantics<parallel>], iteration_bounds = array<i64: 1, 1>, scalar_prefetch = 0 : i64, scratch_operands = 0 : i64, tpu.core_type = #tpu.core_type<tc>, window_params = [{transform_indices = @transform_0, window_bounds = array<i64: 8, 128>}, {transform_indices = @transform_1, window_bounds = array<i64: 8, 128>}, {transform_indices = @transform_2, window_bounds = array<i64: 1, 128>}]} {
    %c0 = arith.constant 0 : index
    %c0_0 = arith.constant 0 : index
    %0 = vector.load %arg2[%c0, %c0_0] : memref<8x128xf32, #tpu.memory_space<vmem>>, vector<8x128xf32>
    %c0_1 = arith.constant 0 : index
    %c0_2 = arith.constant 0 : index
    %1 = vector.load %arg3[%c0_1, %c0_2] : memref<8x128xf32, #tpu.memory_space<vmem>>, vector<8x128xf32>
    %2 = arith.subf %0, %1 : vector<8x128xf32>
    %3 = arith.mulf %2, %2 : vector<8x128xf32>
    %cst = arith.constant dense<0.000000e+00> : vector<128xf32>
    %4 = vector.multi_reduction <add>, %3, %cst [0] : vector<8x128xf32> to vector<128xf32>
    %5 = vector.shape_cast %4 : vector<128xf32> to vector<1x128xf32>
    %c0_3 = arith.constant 0 : index
    %c0_4 = arith.constant 0 : index
    %6 = vector.load %arg4[%c0_3, %c0_4] : memref<1x128xf32, #tpu.memory_space<vmem>>, vector<1x128xf32>
    tpu.vector_store %arg4[%c0_3, %c0_4], %5 {strides = array<i32>} : memref<1x128xf32, #tpu.memory_space<vmem>>, vector<1x128xf32>,
    return
  }
  func.func @transform_0(%arg0: i32, %arg1: i32) -> (i32, i32) {
    %c0_i32 = arith.constant 0 : i32
    return %arg0, %arg1 : i32, i32
  }
  func.func @transform_1(%arg0: i32, %arg1: i32) -> (i32, i32) {
    %c0_i32 = arith.constant 0 : i32
    return %arg0, %arg1 : i32, i32
  }
  func.func @transform_2(%arg0: i32, %arg1: i32) -> (i32, i32) {
    %c0_i32 = arith.constant 0 : i32
    return %arg0, %arg1 : i32, i32
  }
}

</mosaic_0001>

<bundles_post_ra>
// kernel: loss_mse.1
= control target key start
LH: loop header
LB: loop body
LE: loop exit
PB: predicated region body
PF: predicated region fallthrough
CT: control target
= control target key end

     0   :  { %7 = vsyncpa [#allocation3], 0  ;;  %s146_s0 = inlined_call_operand.hbm [shape: f32[8,128], index: 0, kind: input, shape index: {}]   ;;  %s147_s1 = inlined_call_operand.hbm [shape: f32[8,128], index: 1, kind: input, shape index: {}]   ;;  %s148_s2 = inlined_call_operand.vmem [shape: f32[1,128], index: 2, kind: output, shape index: {}]  }
   0x1   :  { %8 = vsyncpa [#allocation5], 0  ;;  %s102_s9 = smov [#allocation2]   ;;  %s103_s11 = smov [#allocation4]  }
   0x2   :  { %s15_s10 = sshll.u32 %s102_s9, 4  ;;  %s25_s12 = sshll.u32 %s103_s11, 4  ;;  %s16_s10 = int_to_ptr.vmem [resolvable:$true] %s15_s10  ;;  %s26_s12 = int_to_ptr.vmem [resolvable:$true] %s25_s12 }
   0x3   :  { %s54_s15 = scalar_lea.hbm %s146_s0, 128 }
   0x4   :  { %p55_p0 = scmp.ne.s32.totalorder %s146_s0, %s54_s15  ;;  %p58_p1 = scmp.lt.u32.totalorder %s54_s15, %s146_s0 }
   0x6   :  { %p60_p2 = pnand %p58_p1, %p55_p0 }
   0x8   :  { %63 = shalt.err (!%p60_p2)
}
   0x9   :  { %s64_s20 = scalar_lea.vmem %s16_s10, 128  ;;  %p69_p4 = scmp.lt.s32.totalorder %s16_s10, %s16_s10 }
   0xa   :  { %p65_p3 = scmp.ne.s32.totalorder %s16_s10, %s64_s20  ;;  %p70_p5 = scmp.lt.s32.totalorder %s64_s20, %s64_s20 }
   0xc   :  { %p71_p6 = por %p70_p5, %p69_p4 }
   0xe   :  { %p72_p7 = pnand %p71_p6, %p65_p3 }
  0x10   :  { %75 = shalt.err (!%p72_p7)
}
  0x11   :  { %18 = dma.hbm_to_vmem [thread:$0]  %s146_s0, 128, %s16_s10, [#allocation3]  }
  0x12   :  { %s76_s25 = scalar_lea.hbm %s147_s1, 128 }
  0x13   :  { %p77_p8 = scmp.ne.s32.totalorder %s147_s1, %s76_s25  ;;  %p80_p9 = scmp.lt.u32.totalorder %s76_s25, %s147_s1 }
  0x15   :  { %p82_p10 = pnand %p80_p9, %p77_p8 }
  0x17   :  { %85 = shalt.err (!%p82_p10)
}
  0x18   :  { %s86_s30 = scalar_lea.vmem %s26_s12, 128  ;;  %p91_p12 = scmp.lt.s32.totalorder %s26_s12, %s26_s12 }
  0x19   :  { %p87_p11 = scmp.ne.s32.totalorder %s26_s12, %s86_s30  ;;  %p92_p13 = scmp.lt.s32.totalorder %s86_s30, %s86_s30 }
  0x1b   :  { %p93_p0 = por %p92_p13, %p91_p12 }
  0x1d   :  { %p94_p1 = pnand %p93_p0, %p87_p11 }
  0x1f   :  { %97 = shalt.err (!%p94_p1)
}
  0x20   :  { %28 = dma.hbm_to_vmem [thread:$0]  %s147_s1, 128, %s26_s12, [#allocation5]  }
  0x21   :  { %98 = dma.done.wait [#allocation3], 128  }
  0x22   :  { %99 = vsyncadd [#allocation3], 4294967168 }
  0x23   :  { %100 = dma.done.wait [#allocation5], 128  }
  0x24   :  { %101 = vsyncadd [#allocation5], 4294967168  ;;  %v35_v0 = vld [vmem:[#allocation2] sm:$0xff]  ;;  %v36_v1 = vld [vmem:[#allocation4] sm:$0xff] }
  0x25   :  { %v37_v2 = vsub.f32 %v35_v0, %v36_v1 }
  0x27   :  { %v38_v3 = vmul.f32 %v37_v2, %v37_v2 }
  0x29   :  { %v39_v4 = vrot.slane %v38_v3, 4 }
  0x2b   :  { %v40_v5 = vadd.f32 %v39_v4, %v38_v3 }
  0x2d   :  { %v41_v6 = vrot.slane %v40_v5, 2 }
  0x2f   :  { %v42_v7 = vadd.f32 %v41_v6, %v40_v5 }
  0x31   :  { %v43_v8 = vrot.slane %v42_v7, 1 }
  0x33   :  { %v44_v9 = vadd.f32 %v43_v8, %v42_v7 }
  0x35   :  { %45 = vst [vmem:[%s148_s2] sm:$0x1] %v44_v9 }
  0x36   :  { %50 = vsyncpa [#allocation3], 1 }
  0x37   :  { %51 = vsyncpa [#allocation5], 1 }

</bundles_post_ra>
